<compile_context>
chip_gen: v6e
topology: v6e:2x2x1
jax: 0.10.0
libtpu: 0.0.40
codegen_flags: <defaults>
</compile_context>

<pallas_src>
import jax
import jax.numpy as jnp
from jax.experimental import pallas as pl
from jax.experimental.pallas import tpu as pltpu


# ----------------------------- kernel -------------------------------------
def _make_affine_kernel(scale, offset):
    """y = x * scale + offset with scalar constants baked in as immediates."""
    scale = float(scale)
    offset = float(offset)

    def kernel(x_ref, o_ref):
        x = x_ref[...]
        o_ref[...] = x * jnp.asarray(scale, x.dtype) + jnp.asarray(offset, x.dtype)

    return kernel


# --------------------------- tiling helper ---------------------------------
def _pick_tile_b(B, F, itemsize):
    """Largest sublane-aligned batch tile that keeps ~4 double-buffered
    tiles (2 in + 2 out) well inside the scoped-VMEM budget on any gen
    (v7x: 64 MiB physical / 32 MiB default scoped)."""
    try:
        vmem_bytes = pltpu.get_tpu_info().vmem_capacity_bytes
    except Exception:
        vmem_bytes = 64 * 1024 * 1024  # conservative (v7x physical)
    per_tile_budget = vmem_bytes // 8  # 4 buffers + ~2x headroom
    tile_b = per_tile_budget // max(1, F * itemsize)
    tile_b = max(8, (tile_b // 8) * 8)  # sublane (8) aligned
    if tile_b >= B:
        return B  # full dim -> always a legal block shape
    return tile_b


# --------------------------- pallas wrapper --------------------------------
def _affine(x, scale, offset):
    """One memory-bound FMA pass over x, tiled along the batch axis."""
    orig_shape = x.shape
    if x.ndim == 1:
        x2 = x.reshape(1, -1)
    elif x.ndim == 2:
        x2 = x
    else:
        x2 = x.reshape(-1, orig_shape[-1])

    B, F = x2.shape
    tb = _pick_tile_b(B, F, x2.dtype.itemsize)

    out = pl.pallas_call(
        _make_affine_kernel(scale, offset),
        out_shape=jax.ShapeDtypeStruct((B, F), x2.dtype),
        grid=(pl.cdiv(B, tb),),
        in_specs=[pl.BlockSpec((tb, F), lambda i: (i, 0))],
        out_specs=pl.BlockSpec((tb, F), lambda i: (i, 0)),
        compiler_params=pltpu.CompilerParams(
            dimension_semantics=("parallel",)),
    )(x2)
    return out.reshape(orig_shape)


# ------------------------------ Model -------------------------------------
class Model:
    """JAX/Pallas port of the PyTorch base Model (no learned parameters)."""

    def __init__(self):
        self.spec = {'normalization': None}

    def forward(self, x):
        # TODO(synk): base-class forward is abstract in torch (raises
        # NotImplementedError); identity passthrough (no kernel launch, no
        # HBM copy) keeps predict() runnable end-to-end.
        return x

    def update_spec(self, spec):
        self.spec.update(spec)

    def _forward_is_identity(self):
        return type(self).forward is Model.forward

    def _affine_params(self):
        """Return ((in_scale, in_offset), (out_scale, out_offset)) so that
        normalize == x*in_scale + in_offset and denorm == x*out_scale + out_offset,
        matching the torch reference (including 1e-8 epsilon placement)."""
        # TODO(synk): assumes scalar statistics; per-feature vectors would need
        # a lane-aligned (1, F) VMEM parameter instead of baked constants.
        norm = self.spec['normalization']
        if norm == 'minmax':
            assert self.spec['input_min'] is not None
            assert self.spec['input_max'] is not None
            assert self.spec['output_min'] is not None
            assert self.spec['output_max'] is not None
            in_div = self.spec['input_max'] - self.spec['input_min'] + 1e-08
            in_scale = 1.0 / in_div
            in_off = -self.spec['input_min'] / in_div
            out_scale = self.spec['output_max'] - self.spec['output_min'] + 1e-08
            out_off = self.spec['output_min']
        elif norm == 'z-score':
            assert self.spec['input_mean'] is not None
            assert self.spec['input_std'] is not None
            assert self.spec['output_mean'] is not None
            assert self.spec['output_std'] is not None
            in_div = self.spec['input_std'] + 1e-08
            in_scale = 1.0 / in_div
            in_off = -self.spec['input_mean'] / in_div
            out_scale = self.spec['output_std'] + 1e-08
            out_off = self.spec['output_mean']
        else:
            raise NotImplementedError
        return (in_scale, in_off), (out_scale, out_off)

    def predict(self, x):
        norm = self.spec['normalization']
        if norm is None:
            return self.forward(x)
        if norm not in ('minmax', 'z-score'):
            raise NotImplementedError

        (in_s, in_o), (out_s, out_o) = self._affine_params()

        if self._forward_is_identity():
            # Fully fused: normalize -> identity forward -> denormalize is a
            # single affine pass (one HBM read + one write, one kernel launch).
            return _affine(x, in_s * out_s, in_o * out_s + out_o)

        # Subclass network: one FMA pass on each side of forward.
        x = _affine(x, in_s, in_o)
        x = self.forward(x)
        return _affine(x, out_s, out_o)


# ------------------------------- main --------------------------------------
if __name__ == "__main__":
    key = jax.random.PRNGKey(0)
    B, F = 8, 128
    x = jax.random.normal(key, (B, F), dtype=jnp.float32)

    model = Model()

    # 1) normalization = None -> predict == forward (identity, zero kernels)
    y_none = model.predict(x)
    jax.block_until_ready(y_none)
    assert jnp.allclose(y_none, x, atol=1e-6), "identity path mismatch"

    # 2) min-max normalization (fused single pass)
    model.update_spec({
        'normalization': 'minmax',
        'input_min': -3.0, 'input_max': 3.0,
        'output_min': -1.0, 'output_max': 1.0,
    })
    y_mm = model.predict(x)
    jax.block_until_ready(y_mm)
    ref_mm = ((x - (-3.0)) / (3.0 - (-3.0) + 1e-08)) * (1.0 - (-1.0) + 1e-08) + (-1.0)
    assert jnp.allclose(y_mm, ref_mm, atol=1e-5), "minmax path mismatch"

    # 3) z-score normalization (fused single pass)
    model.update_spec({
        'normalization': 'z-score',
        'input_mean': 0.1, 'input_std': 1.5,
        'output_mean': -0.2, 'output_std': 2.0,
    })
    y_z = model.predict(x)
    jax.block_until_ready(y_z)
    ref_z = ((x - 0.1) / (1.5 + 1e-08)) * (2.0 + 1e-08) + (-0.2)
    assert jnp.allclose(y_z, ref_z, atol=1e-5), "z-score path mismatch"

    # 4) subclass with a real forward -> unfused path (affine / net / affine)
    class Doubler(Model):
        def forward(self, x):
            return x * 2.0

    sub = Doubler()
    sub.update_spec({
        'normalization': 'z-score',
        'input_mean': 0.1, 'input_std': 1.5,
        'output_mean': -0.2, 'output_std': 2.0,
    })
    y_sub = sub.predict(x)
    jax.block_until_ready(y_sub)
    ref_sub = (((x - 0.1) / (1.5 + 1e-08)) * 2.0) * (2.0 + 1e-08) + (-0.2)
    assert jnp.allclose(y_sub, ref_sub, atol=1e-5), "subclass path mismatch"

    print("KERNEL_OK")
</pallas_src>

<mosaic_0001>
module attributes {stable_mosaic.version = 11 : i64} {
  func.func @kernel(%arg0: i32, %arg1: memref<8x128xf32, #tpu.memory_space<vmem>>, %arg2: memref<8x128xf32, #tpu.memory_space<vmem>>) attributes {dimension_semantics = [#tpu.dimension_semantics<parallel>], iteration_bounds = array<i64: 1>, scalar_prefetch = 0 : i64, scratch_operands = 0 : i64, tpu.core_type = #tpu.core_type<tc>, window_params = [{transform_indices = @transform_0, window_bounds = array<i64: 8, 128>}, {transform_indices = @transform_1, window_bounds = array<i64: 8, 128>}]} {
    %c0 = arith.constant 0 : index
    %c0_0 = arith.constant 0 : index
    %0 = vector.load %arg1[%c0, %c0_0] : memref<8x128xf32, #tpu.memory_space<vmem>>, vector<8x128xf32>
    %cst = arith.constant 0.333333343 : f32
    %1 = vector.broadcast %cst : f32 to vector<8x128xf32>
    %2 = arith.mulf %0, %1 : vector<8x128xf32>
    %cst_1 = arith.constant 3.33333317E-9 : f32
    %3 = vector.broadcast %cst_1 : f32 to vector<8x128xf32>
    %4 = arith.addf %2, %3 : vector<8x128xf32>
    %c0_2 = arith.constant 0 : index
    %c0_3 = arith.constant 0 : index
    %5 = vector.load %arg2[%c0_2, %c0_3] : memref<8x128xf32, #tpu.memory_space<vmem>>, vector<8x128xf32>
    tpu.vector_store %arg2[%c0_2, %c0_3], %4 {strides = array<i32>} : memref<8x128xf32, #tpu.memory_space<vmem>>, vector<8x128xf32>,
    return
  }
  func.func @transform_0(%arg0: i32) -> (i32, i32) {
    %c0_i32 = arith.constant 0 : i32
    %c0_i32_0 = arith.constant 0 : i32
    return %arg0, %c0_i32 : i32, i32
  }
  func.func @transform_1(%arg0: i32) -> (i32, i32) {
    %c0_i32 = arith.constant 0 : i32
    %c0_i32_0 = arith.constant 0 : i32
    return %arg0, %c0_i32 : i32, i32
  }
}

</mosaic_0001>

<bundles_post_ra>
// kernel: tpu_custom_call.1
= control target key start
LH: loop header
LB: loop body
LE: loop exit
PB: predicated region body
PF: predicated region fallthrough
CT: control target
= control target key end

     0   :  { %6 = vsyncpa [#allocation3], 0  ;;  %s104_s0 = inlined_call_operand.hbm [shape: f32[8,128], index: 0, kind: input, shape index: {}]   ;;  %s105_s1 = inlined_call_operand.hbm [shape: f32[8,128], index: 1, kind: output, shape index: {}]  }
   0x1   :  { %7 = vsyncpa [#allocation4], 0  ;;  %s86_s6 = smov [#allocation2]  }
   0x2   :  { %s14_s7 = sshll.u32 %s86_s6, 4  ;;  %s15_s7 = int_to_ptr.vmem [resolvable:$true] %s14_s7 }
   0x3   :  { %s50_s8 = scalar_lea.vmem %s15_s7, 128  ;;  %p55_p1 = scmp.lt.s32.totalorder %s15_s7, %s15_s7 }
   0x4   :  { %p51_p0 = scmp.ne.s32.totalorder %s15_s7, %s50_s8  ;;  %p56_p2 = scmp.lt.s32.totalorder %s50_s8, %s50_s8 }
   0x6   :  { %p57_p3 = por %p56_p2, %p55_p1 }
   0x8   :  { %p58_p4 = pnand %p57_p3, %p51_p0 }
   0xa   :  { %61 = shalt.err (!%p58_p4)
}
   0xb   :  { %17 = dma.hbm_to_vmem [thread:$0]  %s104_s0, 128, %s15_s7, [#allocation3]  }
   0xc   :  { %82 = dma.done.wait [#allocation3], 128  }
   0xd   :  { %83 = vsyncadd [#allocation3], 4294967168  ;;  %v21_v0 = vld [vmem:[#allocation2] sm:$0xff]  ;;  %s87_s11 = smov [#allocation5]  }
   0xe   :  { %s31_s12 = sshll.u32 %s87_s11, 4  ;;  %v22_v1 = vmul.f32 0.33333334, %v21_v0  ;;  %s32_s12 = int_to_ptr.vmem [resolvable:$true] %s31_s12 }
   0xf   :  { %s62_s13 = scalar_lea.vmem %s32_s12, 128  ;;  %p67_p6 = scmp.lt.s32.totalorder %s32_s12, %s32_s12 }
  0x10   :  { %v23_v2 = vadd.f32 3.3333332e-09, %v22_v1  ;;  %p63_p5 = scmp.ne.s32.totalorder %s32_s12, %s62_s13  ;;  %p68_p7 = scmp.lt.s32.totalorder %s62_s13, %s62_s13 }
  0x12   :  { %24 = vst [vmem:[#allocation5] sm:$0xff] %v23_v2  ;;  %p69_p8 = por %p68_p7, %p67_p6 }
  0x14   :  { %p70_p9 = pnand %p69_p8, %p63_p5 }
  0x16   :  { %73 = shalt.err (!%p70_p9)
}
  0x17   :  { %34 = dma.vmem_to_hbm [thread:$0]  %s32_s12, 128, %s105_s1, [#allocation4]  }
  0x18   :  { %84 = dma.done.wait [#allocation4], 128  }
  0x19   :  { %85 = vsyncadd [#allocation4], 4294967168 }
  0x1a   :  { %38 = vsyncpa [#allocation3], 1 }
  0x1b   :  { %39 = vsyncpa [#allocation4], 1 }

</bundles_post_ra>
